<compile_context>
chip_gen: v7x
topology: tpu7x:2x2x1
jax: 0.10.0
libtpu: 0.0.40
codegen_flags: <defaults>
</compile_context>

<pallas_src>
import math

import jax
import jax.numpy as jnp
from jax.experimental import pallas as pl
from jax.experimental.pallas import tpu as pltpu


def _round_up(x: int, m: int) -> int:
    return ((x + m - 1) // m) * m


def _sublane_multiple(dtype) -> int:
    itemsize = jnp.dtype(dtype).itemsize
    if itemsize >= 4:
        return 8
    if itemsize == 2:
        return 16
    return 32


def _choose_tile(n_rows: int, row_bytes: int, mult: int,
                 target_block_bytes: int, max_block_bytes: int,
                 min_grid_steps: int = 4) -> int:
    """Rows per grid step: aim for ~target_block_bytes output blocks, cap at
    max_block_bytes (double-buffered output then stays well inside v5e's
    16 MiB scoped-VMEM default), and shrink so the grid has >= min_grid_steps
    steps when there is enough work (keeps both v7x TensorCores busy)."""
    tile = max(mult, (target_block_bytes // max(row_bytes, 1)) // mult * mult)
    cap = max(mult, (max_block_bytes // max(row_bytes, 1)) // mult * mult)
    tile = min(tile, cap)
    tile = min(tile, _round_up(n_rows, mult))
    if n_rows > mult * min_grid_steps:
        tile = min(tile, _round_up(pl.cdiv(n_rows, min_grid_steps), mult))
    return max(tile, mult)


def _fourier_kernel(tg_ref, ww_ref, ph_ref, out_ref):
    # tg_ref : (tile, G)  f32 -- G batch elements per (grouped) output row
    # ww_ref : (1, W)     f32 -- weights * 2*pi, tiled once per group (W = G*dim)
    # ph_ref : (1, W)     f32 -- 0 for sin lanes, pi/2 for cos lanes
    # out_ref: (tile, W)      -- lane-dense (W % 128 == 0)
    tile_rows, g_per_row = tg_ref.shape
    w_lanes = out_ref.shape[-1]
    dim = w_lanes // g_per_row

    # Expand t across its group's dim lanes: lane j of row r takes
    # tg[r, j // dim].  Done with G-1 broadcast+selects (VPU only, exact;
    # no MXU / integer-division lowering risk).
    t_exp = tg_ref[:, 0:1]
    if g_per_row > 1:
        lane = jax.lax.broadcasted_iota(jnp.int32, (tile_rows, w_lanes), 1)
        for g in range(1, g_per_row):
            t_exp = jnp.where(lane >= g * dim, tg_ref[:, g:g + 1], t_exp)

    # cos(x) == sin(x + pi/2): one transcendental per output element.
    freqs = t_exp * ww_ref[...] + ph_ref[...]
    out_ref[...] = (jnp.sin(freqs) * math.sqrt(2.0)).astype(out_ref.dtype)


def fourier_encoder(t, weights, *, out_dtype=None,
                    target_block_bytes: int = 2 << 20,
                    max_block_bytes: int = 6 << 20,
                    min_pallas_bytes: int = 1 << 20):
    """t: (bs, 1, 1, 1) (any shape with one scalar per batch element),
    weights: (1, half_dim).  Returns (bs, 2 * half_dim)."""
    half_dim = weights.shape[-1]
    dim = 2 * half_dim

    if out_dtype is None:
        # f32 module -> f32 (exact semantics); bf16 activations -> bf16 output.
        out_dtype = jnp.result_type(t.dtype, weights.dtype)
    out_dtype = jnp.dtype(out_dtype)

    t_flat = t.reshape(-1).astype(jnp.float32)        # matches t.view(-1, 1)
    bs = t_flat.shape[0]
    w_flat = weights.reshape(half_dim).astype(jnp.float32)

    # Small problems: launch overhead dominates; let XLA fuse it.
    if bs * dim * out_dtype.itemsize < min_pallas_bytes:
        freqs = t_flat[:, None] * w_flat[None, :] * 2.0 * math.pi
        out = jnp.concatenate([jnp.sin(freqs), jnp.cos(freqs)], axis=-1)
        return (out * math.sqrt(2.0)).astype(out_dtype)

    # Lane-dense grouping: view (bs, dim) as (bs/G, G*dim), W multiple of 128.
    g = 128 // math.gcd(dim, 128)
    w_lanes = g * dim

    # Per-lane scaled weights + phase (cos == sin shifted by pi/2).
    ww_dim = jnp.concatenate([w_flat, w_flat]) * (2.0 * math.pi)            # (dim,)
    ph_dim = jnp.concatenate([jnp.zeros((half_dim,), jnp.float32),
                              jnp.full((half_dim,), 0.5 * math.pi, jnp.float32)])
    ww_row = jnp.tile(ww_dim, g).reshape(1, w_lanes)
    ph_row = jnp.tile(ph_dim, g).reshape(1, w_lanes)

    # Tile the grouped batch rows.
    mult = _sublane_multiple(out_dtype)
    n_rows = pl.cdiv(bs, g)
    row_bytes = w_lanes * out_dtype.itemsize
    tile = _choose_tile(n_rows, row_bytes, mult, target_block_bytes, max_block_bytes)
    rows_pad = _round_up(n_rows, tile)
    grid = (rows_pad // tile,)

    pad = rows_pad * g - bs
    if pad:
        t_flat = jnp.pad(t_flat, (0, pad))
    t_grouped = t_flat.reshape(rows_pad, g)

    n_elems = rows_pad * w_lanes
    cost = pl.CostEstimate(
        flops=3 * n_elems,                                   # mul + add + scale
        transcendentals=n_elems,                             # one sin per element
        bytes_accessed=(n_elems * out_dtype.itemsize         # output
                        + rows_pad * g * 4                   # t
                        + 2 * w_lanes * 4),                  # weights + phase rows
    )

    out_wide = pl.pallas_call(
        _fourier_kernel,
        out_shape=jax.ShapeDtypeStruct((rows_pad, w_lanes), out_dtype),
        grid=grid,
        in_specs=[
            pl.BlockSpec((tile, g), lambda i: (i, 0)),        # grouped t
            pl.BlockSpec((1, w_lanes), lambda i: (0, 0)),     # weights row (resident)
            pl.BlockSpec((1, w_lanes), lambda i: (0, 0)),     # phase row (resident)
        ],
        out_specs=pl.BlockSpec((tile, w_lanes), lambda i: (i, 0)),
        compiler_params=pltpu.CompilerParams(
            dimension_semantics=("parallel",),
        ),
        cost_estimate=cost,
    )(t_grouped, ww_row, ph_row)

    # Byte-identical view back to (rows_pad * G, dim); drop batch padding.
    out = out_wide.reshape(rows_pad * g, dim)
    if rows_pad * g != bs:
        out = out[:bs]
    return out


def fourier_encoder_ref(t, weights):
    """Pure-JAX reference mirroring the PyTorch forward exactly."""
    t2 = t.reshape(-1, 1).astype(jnp.float32)
    freqs = t2 * weights.astype(jnp.float32) * 2.0 * math.pi
    return jnp.concatenate([jnp.sin(freqs), jnp.cos(freqs)], axis=-1) * math.sqrt(2.0)


if __name__ == "__main__":
    key = jax.random.PRNGKey(0)
    k_t, k_w, k_t2, k_w2 = jax.random.split(key, 4)

    # Case 1: module-scale shapes, dim=64 -> grouped lane-dense path (G=2).
    bs, dim = 8, 64
    weights = jax.random.normal(k_w, (1, dim // 2), dtype=jnp.float32)
    t = jax.random.uniform(k_t, (bs, 1, 1, 1), dtype=jnp.float32)
    out = jax.block_until_ready(fourier_encoder(t, weights, min_pallas_bytes=0))
    ref = fourier_encoder_ref(t, weights)
    assert out.shape == (bs, dim), out.shape
    assert jnp.allclose(out, ref, atol=1e-4, rtol=1e-5), "mismatch (dim=64 grouped)"

    # Case 2: half_dim % 128 == 0 (G=1), multi-step grid + batch padding.
    bs2, dim2 = 300, 256
    w2 = jax.random.normal(k_w2, (1, dim2 // 2), dtype=jnp.float32)
    t2 = jax.random.uniform(k_t2, (bs2, 1, 1, 1), dtype=jnp.float32)
    out2 = jax.block_until_ready(
        fourier_encoder(t2, w2, min_pallas_bytes=0, target_block_bytes=32 * 1024))
    ref2 = fourier_encoder_ref(t2, w2)
    assert out2.shape == (bs2, dim2), out2.shape
    assert jnp.allclose(out2, ref2, atol=1e-4, rtol=1e-5), "mismatch (dim=256 grid)"

    # Case 3: bf16 output path (recommended for large batched sampling).
    out3 = jax.block_until_ready(
        fourier_encoder(t2, w2, out_dtype=jnp.bfloat16, min_pallas_bytes=0,
                        target_block_bytes=32 * 1024))
    assert out3.dtype == jnp.bfloat16, out3.dtype
    assert jnp.allclose(out3.astype(jnp.float32), ref2, atol=2e-2, rtol=2e-2), \
        "mismatch (bf16 output)"

    print("KERNEL_OK")
</pallas_src>

<mosaic_0001>
module attributes {stable_mosaic.version = 11 : i64} {
  func.func @_fourier_kernel(%arg0: i32, %arg1: memref<8x2xf32, #tpu.memory_space<vmem>>, %arg2: memref<1x128xf32, #tpu.memory_space<vmem>>, %arg3: memref<1x128xf32, #tpu.memory_space<vmem>>, %arg4: memref<8x128xf32, #tpu.memory_space<vmem>>) attributes {dimension_semantics = [#tpu.dimension_semantics<parallel>], iteration_bounds = array<i64: 1>, scalar_prefetch = 0 : i64, scratch_operands = 0 : i64, tpu.core_type = #tpu.core_type<tc>, window_params = [{transform_indices = @transform_0, window_bounds = array<i64: 8, 2>}, {pipeline_mode = #tpu.pipeline_mode<synchronous>, transform_indices = @transform_1, window_bounds = array<i64: 1, 128>}, {pipeline_mode = #tpu.pipeline_mode<synchronous>, transform_indices = @transform_2, window_bounds = array<i64: 1, 128>}, {transform_indices = @transform_3, window_bounds = array<i64: 8, 128>}]} {
    %c0 = arith.constant 0 : index
    %c0_0 = arith.constant 0 : index
    %0 = vector.load %arg1[%c0, %c0_0] : memref<8x2xf32, #tpu.memory_space<vmem>>, vector<8x1xf32>
    %1 = tpu.iota {dimensions = array<i32: 1>} : vector<8x128xi32>
    %c64_i32 = arith.constant 64 : i32
    %2 = vector.broadcast %c64_i32 : i32 to vector<8x128xi32>
    %3 = arith.cmpi sge, %1, %2 : vector<8x128xi32>
    %c0_1 = arith.constant 0 : index
    %c1 = arith.constant 1 : index
    %4 = vector.load %arg1[%c0_1, %c1] : memref<8x2xf32, #tpu.memory_space<vmem>>, vector<8x1xf32>
    %5 = vector.shape_cast %4 : vector<8x1xf32> to vector<8x1xf32>
    %6 = vector.broadcast %5 : vector<8x1xf32> to vector<8x128xf32>
    %7 = vector.shape_cast %0 : vector<8x1xf32> to vector<8x1xf32>
    %8 = vector.broadcast %7 : vector<8x1xf32> to vector<8x128xf32>
    %9 = arith.select %3, %6, %8 : vector<8x128xi1>, vector<8x128xf32>
    %c0_2 = arith.constant 0 : index
    %c0_3 = arith.constant 0 : index
    %10 = vector.load %arg2[%c0_2, %c0_3] : memref<1x128xf32, #tpu.memory_space<vmem>>, vector<1x128xf32>
    %11 = vector.broadcast %10 : vector<1x128xf32> to vector<8x128xf32>
    %12 = arith.mulf %9, %11 : vector<8x128xf32>
    %c0_4 = arith.constant 0 : index
    %c0_5 = arith.constant 0 : index
    %13 = vector.load %arg3[%c0_4, %c0_5] : memref<1x128xf32, #tpu.memory_space<vmem>>, vector<1x128xf32>
    %14 = vector.broadcast %13 : vector<1x128xf32> to vector<8x128xf32>
    %15 = arith.addf %12, %14 : vector<8x128xf32>
    %16 = math.sin %15 : vector<8x128xf32>
    %cst = arith.constant 1.41421354 : f32
    %17 = vector.broadcast %cst : f32 to vector<8x128xf32>
    %18 = arith.mulf %16, %17 : vector<8x128xf32>
    %c0_6 = arith.constant 0 : index
    %c0_7 = arith.constant 0 : index
    %19 = vector.load %arg4[%c0_6, %c0_7] : memref<8x128xf32, #tpu.memory_space<vmem>>, vector<8x128xf32>
    tpu.vector_store %arg4[%c0_6, %c0_7], %18 {strides = array<i32>} : memref<8x128xf32, #tpu.memory_space<vmem>>, vector<8x128xf32>,
    return
  }
  func.func @transform_0(%arg0: i32) -> (i32, i32) {
    %c0_i32 = arith.constant 0 : i32
    %c0_i32_0 = arith.constant 0 : i32
    return %arg0, %c0_i32 : i32, i32
  }
  func.func @transform_1(%arg0: i32) -> (i32, i32) {
    %c0_i32 = arith.constant 0 : i32
    %c0_i32_0 = arith.constant 0 : i32
    %c0_i32_1 = arith.constant 0 : i32
    return %c0_i32, %c0_i32_0 : i32, i32
  }
  func.func @transform_2(%arg0: i32) -> (i32, i32) {
    %c0_i32 = arith.constant 0 : i32
    %c0_i32_0 = arith.constant 0 : i32
    %c0_i32_1 = arith.constant 0 : i32
    return %c0_i32, %c0_i32_0 : i32, i32
  }
  func.func @transform_3(%arg0: i32) -> (i32, i32) {
    %c0_i32 = arith.constant 0 : i32
    %c0_i32_0 = arith.constant 0 : i32
    return %arg0, %c0_i32 : i32, i32
  }
}

</mosaic_0001>

<bundles_post_ra>
// kernel: tpu_custom_call.1
= control target key start
LH: loop header
LB: loop body
LE: loop exit
PB: predicated region body
PF: predicated region fallthrough
CT: control target
= control target key end

     0   :  { %s285_s0 = inlined_call_operand.vmem [shape: f32[8,2], index: 0, kind: input, shape index: {}]   ;;  %s286_s1 = inlined_call_operand.vmem [shape: f32[1,128], index: 1, kind: input, shape index: {}]   ;;  %s287_s2 = inlined_call_operand.vmem [shape: f32[1,128], index: 2, kind: input, shape index: {}]   ;;  %s288_s3 = inlined_call_operand.hbm [shape: f32[8,128], index: 3, kind: output, shape index: {}]  }
   0x1   :  { %v15_v0 = vld [vmem:[%s285_s0] sm:$0xff] }
   0x2   :  { %8 = vsyncpa [#allocation3], 0  ;;  %v214_v1 = vmov 1   ;;  %v215_v2 = vmov 0   ;;  %v16_v3 = vlaneseq  ;;  %v165_v6 = vld [vmem:[%s286_s1] ss:$0 sm:$0xff] }
   0x3   :  { %184 = vset.pattern.permute.xlu0 %v214_v1  ;;  %v166_v8 = vld [vmem:[%s287_s2] ss:$0 sm:$0xff]  ;;  %v216_v22 = vmov 683565275   ;;  %v217_v24 = vmov 2475754826  }
   0x4   :  { %21 = vperm.xlu0 %184, %v15_v0   ;;  %v17_v4 = vand.u32 127, %v16_v3  ;;  %v218_v27 = vmov 2131351028   ;;  %v219_v30 = vmov 2102212464   ;;  %s222_s0 = smov [#allocation2]  }
   0x5   :  { %v220_v33 = vmov 920167782   ;;  %v221_v36 = vmov 1326507024   ;;  %s157_s1 = sshll.u32 %s222_s0, 4  ;;  %s158_s1 = int_to_ptr.vmem [resolvable:$true] %s157_s1 }
   0x6   :  { %vm18_vm0 = vcmp.ge.s32.totalorder %v17_v4, 64  ;;  %s190_s2 = scalar_lea.vmem %s158_s1, 128  ;;  %p195_p1 = scmp.lt.s32.totalorder %s158_s1, %s158_s1 }
   0x7   :  { %p191_p0 = scmp.ne.s32.totalorder %s158_s1, %s190_s2  ;;  %p196_p2 = scmp.lt.s32.totalorder %s190_s2, %s190_s2 }
   0x8   :  { %185 = vset.pattern.permute.xlu0 %v215_v2 }
   0x9   :  { %25 = vperm.xlu0 %185, %v15_v0   ;;  %p197_p3 = por %p196_p2, %p195_p1 }
   0xb   :  { %p198_p4 = pnand %p197_p3, %p191_p0 }
  0x83   :  { %v22_v5 = vpop.permute.xlu0 %21 }
  0x88   :  { %v26_v7 = vpop.permute.xlu0 %25 }
  0x89   :  { %v28_v9 = vsel %vm18_vm0, %v22_v5, %v26_v7 }
  0x8a   :  { %v36_v10 = vmul.f32 %v165_v6, %v28_v9 }
  0x8c   :  { %v252_v11 = vadd.f32 %v166_v8, %v36_v10 }
  0x8e   :  { %v48_v12 = vand.u32 2139095040, %v252_v11  ;;  %v45_v16 = vand.u32 2147483647, %v252_v11  ;;  %vm47_vm8 = vcmp.lt.s32.totalorder %v252_v11, 0  ;;  %vm137_vm13 = vweird.f32 %v252_v11 }
  0x90   :  { %v49_v13 = vshrl.u32 %v48_v12, 23  ;;  %v52_v20 = vand.u32 8388607, %v45_v16  ;;  %vm46_vm9 = vcmp.le.f32.partialorder %v45_v16, 0.7853982 }
  0x92   :  { %v167_v14 = vadd.s32 4294967169, %v49_v13  ;;  %v53_v38 = vor.u32 8388608, %v52_v20 }
  0x94   :  { %v55_v15 = vadd.s32 1, %v167_v14  ;;  %v93_v52 = vshll.u32 %v53_v38, 8 }
  0x96   :  { %vm56_vm1 = vcmp.gt.s32.totalorder %v55_v15, 0 }
  0x97   :  { %v57_v17 = vsel %vm56_vm1, %v55_v15, 0 }
  0x98   :  { %v59_v18 = vand.u32 31, %v57_v17  ;;  %v58_v21 = vshrl.u32 %v57_v17, 5 }
  0x9a   :  { %v60_v19 = vsub.s32 32, %v59_v18  ;;  %v62_v23 = vshll.u32 %v216_v22, %v59_v18  ;;  %v65_v25 = vshll.u32 %v217_v24, %v59_v18  ;;  %v68_v29 = vshll.u32 %v218_v27, %v59_v18 }
  0x9b   :  { %v71_v32 = vshll.u32 %v219_v30, %v59_v18  ;;  %v74_v35 = vshll.u32 %v220_v33, %v59_v18  ;;  %vm77_vm2 = vcmp.lt.s32.totalorder %v58_v21, 1  ;;  %vm80_vm3 = vcmp.lt.s32.totalorder %v58_v21, 4 }
  0x9c   :  { %v63_v26 = vshrl.u32 %v217_v24, %v60_v19  ;;  %v66_v28 = vshrl.u32 %v218_v27, %v60_v19  ;;  %v69_v31 = vshrl.u32 %v219_v30, %v60_v19  ;;  %v72_v34 = vshrl.u32 %v220_v33, %v60_v19 }
  0x9d   :  { %v75_v37 = vshrl.u32 %v221_v36, %v60_v19  ;;  %v61_v47 = vshrl.u32 %v216_v22, %v60_v19  ;;  %vm79_vm4 = vcmp.lt.s32.totalorder %v58_v21, 3  ;;  %vm78_vm5 = vcmp.lt.s32.totalorder %v58_v21, 2 }
  0x9e   :  { %v64_v39 = vor.u32 %v63_v26, %v62_v23  ;;  %v67_v40 = vor.u32 %v66_v28, %v65_v25  ;;  %v70_v41 = vor.u32 %v69_v31, %v68_v29  ;;  %v73_v42 = vor.u32 %v72_v34, %v71_v32 }
  0x9f   :  { %v76_v43 = vor.u32 %v75_v37, %v74_v35 }
  0xa0   :  { %v82_v44 = vsel %vm80_vm3, %v70_v41, 2102212464  ;;  %v85_v45 = vsel %vm77_vm2, %v64_v39, %v67_v40  ;;  %v89_v46 = vsel %vm77_vm2, %v67_v40, %v70_v41  ;;  %v86_v48 = vsel %vm80_vm3, %v73_v42, 920167782 }
  0xa1   :  { %v90_v49 = vsel %vm80_vm3, %v76_v43, 1326507024  ;;  %v87_v50 = vsel %vm79_vm4, %v70_v41, %v86_v48  ;;  %v81_v53 = vsel %vm77_vm2, %v61_v47, %v64_v39  ;;  %v83_v54 = vsel %vm79_vm4, %v67_v40, %v82_v44 }
  0xa2   :  { %v91_v51 = vsel %vm79_vm4, %v73_v42, %v90_v49  ;;  %v88_v55 = vsel %vm78_vm5, %v85_v45, %v87_v50  ;;  %v84_v61 = vsel %vm78_vm5, %v81_v53, %v83_v54 }
  0xa3   :  { %v92_v56 = vsel %vm78_vm5, %v89_v46, %v91_v51  ;;  %v261_v59 = vmul.u32.u64.low %v93_v52, %v88_v55  ;;  %v262_v60 = vmul.u32.u64.high %v93_v52, %v88_v55, %v261_v59  ;;  %v100_v63 = vmul.u32 %v93_v52, %v84_v61 }
  0xa4   :  { %v258_v57 = vmul.u32.u64.low %v93_v52, %v92_v56  ;;  %v259_v58 = vmul.u32.u64.high %v93_v52, %v92_v56, %v258_v57 }
  0xa5   :  { %v103_v62 = vadd.s32 1, %v262_v60 }
  0xa6   :  { %vm102_vm6 = vc.u32 %v259_v58, %v261_v59  ;;  %v101_v12 = vadd.s32 %v261_v59, %v259_v58 }
  0xa7   :  { %v104_v0 = vsel %vm102_vm6, %v103_v62, %v262_v60 }
  0xa8   :  { %v105_v1 = vadd.s32 %v104_v0, %v100_v63 }
  0xaa   :  { %v106_v2 = vadd.s32 536870912, %v105_v1 }
  0xac   :  { %v107_v3 = vshrl.u32 %v106_v2, 30 }
  0xae   :  { %v108_v4 = vshll.u32 %v107_v3, 30  ;;  %v131_v25 = vsub.s32 4, %v107_v3 }
  0xb0   :  { %v109_v5 = vsub.s32 %v105_v1, %v108_v4  ;;  %v132_v28 = vsel %vm47_vm8, %v131_v25, %v107_v3 }
  0xb1   :  { %v134_v30 = vsel %vm46_vm9, 0, %v132_v28 }
  0xb2   :  { %v111_v6 = vsub.s32 0, %v109_v5  ;;  %v138_v31 = vadd.s32 3, %v134_v30 }
  0xb4   :  { %v168_v7 = vmin.u32 %v111_v6, %v109_v5  ;;  %v139_v32 = vand.u32 3, %v138_v31 }
  0xb6   :  { %v113_v8 = vclz %v168_v7  ;;  %vm144_vm10 = vcmp.eq.s32.totalorder %v139_v32, 2  ;;  %vm141_vm11 = vcmp.eq.s32.totalorder %v139_v32, 0  ;;  %vm140_vm12 = vcmp.lt.s32.totalorder %v139_v32, 2 }
  0xb8   :  { %v169_v9 = vadd.s32 4294967294, %v113_v8 }
  0xba   :  { %vm170_vm7 = vcmp.lt.s32.totalorder %v169_v9, 0 }
  0xbb   :  { %v116_v10 = vsel %vm170_vm7, 0, %v169_v9 }
  0xbc   :  { %v117_v13 = vsub.s32 32, %v116_v10  ;;  %v121_v14 = vsub.s32 4294967266, %v116_v10  ;;  %v118_v15 = vshll.u32 %v109_v5, %v116_v10 }
  0xbe   :  { %v119_v17 = vshrl.u32 %v101_v12, %v117_v13  ;;  %v122_v18 = vadd.s32 127, %v121_v14 }
  0xc0   :  { %v120_v19 = vor.u32 %v119_v17, %v118_v15  ;;  %v123_v20 = vshll.u32 %v122_v18, 23 }
  0xc2   :  { %v124_v21 = vor.u32 4788187, %v123_v20  ;;  %v127_v23 = vcvt.s32.f32 %v120_v19 }
  0xc4   :  { %v125_v22 = vand.u32 2147483647, %v124_v21 }
  0xc6   :  { %v128_v24 = vmul.f32 %v127_v23, %v125_v22 }
  0xc8   :  { %v129_v26 = vxor.u32 2147483648, %v128_v24 }
  0xca   :  { %v130_v27 = vsel %vm47_vm8, %v129_v26, %v128_v24 }
  0xcb   :  { %v133_v29 = vsel %vm46_vm9, %v252_v11, %v130_v27 }
  0xcc   :  { %186 = vcosq.f32 %v133_v29 }
  0xcd   :  { %188 = vsinq.f32 %v133_v29 }
  0xd6   :  { %v187_v33 = vpop.eup %186 }
  0xd7   :  { %v189_v34 = vpop.eup %188  ;;  %v145_v35 = vxor.u32 2147483648, %v187_v33 }
  0xd8   :  { %v142_v36 = vxor.u32 2147483648, %v189_v34 }
  0xd9   :  { %v146_v37 = vsel %vm144_vm10, %v145_v35, %v189_v34 }
  0xda   :  { %v143_v38 = vsel %vm141_vm11, %v187_v33, %v142_v36 }
  0xdb   :  { %v147_v16 = vsel %vm140_vm12, %v143_v38, %v146_v37 }
  0xdc   :  { %v148_v39 = vsel %vm137_vm13, nan, %v147_v16 }
  0xdd   :  { %v149_v40 = vmul.f32 1.4142135, %v148_v39 }
  0xdf   :  { %150 = vst [vmem:[#allocation2] sm:$0xff] %v149_v40 }
  0xe0   :  { %201 = shalt.err (!%p198_p4)
}
  0xe1   :  { %s202_s20 = scalar_lea.hbm %s288_s3, 128 }
  0xe2   :  { %p203_p5 = scmp.ne.s32.totalorder %s288_s3, %s202_s20  ;;  %p206_p6 = scmp.lt.u32.totalorder %s202_s20, %s288_s3 }
  0xe4   :  { %p208_p7 = pnand %p206_p6, %p203_p5 }
  0xe6   :  { %211 = shalt.err (!%p208_p7)
}
  0xe7   :  { %160 = dma.vmem_to_hbm [thread:$0]  %s158_s1, 128, %s288_s3, [#allocation3]  }
  0xe8   :  { %212 = dma.done.wait [#allocation3], 128  }
  0xe9   :  { %213 = vsyncadd [#allocation3], 4294967168 }
  0xea   :  { %164 = vsyncpa [#allocation3], 1 }

</bundles_post_ra>
